<compile_context>
chip_gen: v7x
topology: tpu7x:2x2x1
jax: 0.10.0
libtpu: 0.0.40
codegen_flags: <defaults>
</compile_context>

<pallas_src>
import jax
import jax.numpy as jnp
from jax.experimental import pallas as pl
from jax.experimental.pallas import tpu as pltpu


# ----------------------------- Pallas kernels -----------------------------

def _gcn2_kernel(adj_ref, uf_ref, vf_ref,
                 w1_ref, bu1_ref, bv1_ref,
                 w2_ref, bu2_ref, bv2_ref,
                 uz_ref, vz_ref):
    """Two fused GraphConvolution layers.

    adj_ref : (R, Nu, Nv) rating-class adjacency (loaded from HBM once).
    w*_ref  : (R, D, H) ordinal-accumulated (cumsum over classes) weights.
    The item-side aggregation uses dot_general contracting over Nu, which
    replaces the previously materialized adjacency transpose.
    """
    R = adj_ref.shape[0]
    adj = adj_ref[...]                                         # (R, Nu, Nv)

    def layer(u_feat, v_feat, w_ref, bu_ref, bv_ref):
        uz = None
        vz = None
        for r in range(R):                                     # R is small & static
            w = w_ref[r]                                       # (D, H)
            msg_u = jnp.dot(u_feat, w, preferred_element_type=jnp.float32)  # (Nu, H)
            msg_v = jnp.dot(v_feat, w, preferred_element_type=jnp.float32)  # (Nv, H)
            a = adj[r]                                         # (Nu, Nv)
            uz_r = jnp.dot(a, msg_v, preferred_element_type=jnp.float32)    # (Nu, H)
            # adj^T @ msg_u without materializing the transpose:
            vz_r = jax.lax.dot_general(
                a, msg_u, (((0,), (0,)), ((), ())),
                preferred_element_type=jnp.float32)            # (Nv, H)
            uz = uz_r if uz is None else uz + uz_r
            vz = vz_r if vz is None else vz + vz_r
        uz = jnp.maximum(uz + bu_ref[...], 0.0)
        vz = jnp.maximum(vz + bv_ref[...], 0.0)
        return uz, vz

    uz1, vz1 = layer(uf_ref[...], vf_ref[...], w1_ref, bu1_ref, bv1_ref)
    uz2, vz2 = layer(uz1, vz1, w2_ref, bu2_ref, bv2_ref)
    uz_ref[...] = uz2
    vz_ref[...] = vz2


def _decoder_kernel(uz_ref, us_ref, vz_ref, vs_ref,
                    wu1t_ref, bu1_ref, wuz_ref, wuf_ref,
                    wv1t_ref, bv1_ref, wvz_ref, wvf_ref,
                    p_ref, a_ref,
                    out_ref, mhat_ref):
    """Fused dense side path + BilinearMixture decoder (single grid step).

    u_h = u_z @ Wz^T + relu(u_side @ W1^T + b1) @ Wf^T   (concat eliminated)
    logits[u,v,c] = sum_b a[b,c] * (u_h P_b v_h^T)[u,v]
    output = softmax_c(logits); m_hat = sum_c output * (c+1)
    """
    # --- dense side path (user branch) ---
    u_f = jnp.maximum(
        jnp.dot(us_ref[...], wu1t_ref[...], preferred_element_type=jnp.float32)
        + bu1_ref[...], 0.0)
    # TODO(synk): F.dropout modeled as identity (example runs with dropout p = 0.0)
    u_h = (jnp.dot(uz_ref[...], wuz_ref[...], preferred_element_type=jnp.float32)
           + jnp.dot(u_f, wuf_ref[...], preferred_element_type=jnp.float32))

    # --- dense side path (item branch) ---
    v_f = jnp.maximum(
        jnp.dot(vs_ref[...], wv1t_ref[...], preferred_element_type=jnp.float32)
        + bv1_ref[...], 0.0)
    v_h = (jnp.dot(vz_ref[...], wvz_ref[...], preferred_element_type=jnp.float32)
           + jnp.dot(v_f, wvf_ref[...], preferred_element_type=jnp.float32))

    # --- bilinear mixture decoder: all bases handled in-register ---
    nb = p_ref.shape[0]
    logits = None
    for b in range(nb):                                        # nb is small & static
        uP = jnp.dot(u_h, p_ref[b], preferred_element_type=jnp.float32)      # (Bu, H)
        score = jax.lax.dot_general(                                         # (Bu, Bv)
            uP, v_h, (((1,), (1,)), ((), ())),
            preferred_element_type=jnp.float32)
        a_row = a_ref[b:b + 1, :]                                            # (1, C)
        contrib = score[:, :, None] * a_row                                  # (Bu, Bv, C)
        logits = contrib if logits is None else logits + contrib

    m = jnp.max(logits, axis=-1, keepdims=True)
    e = jnp.exp(logits - m)
    denom = jnp.sum(e, axis=-1, keepdims=True)
    probs = e * pl.reciprocal(denom, approx=True)              # EUP, frees VALU slots
    out_ref[...] = probs
    cls = jax.lax.broadcasted_iota(jnp.float32, probs.shape, 2) + 1.0
    mhat_ref[...] = jnp.sum(probs * cls, axis=-1)


# ------------------------------ wrappers ------------------------------

_COMPILER_PARAMS = pltpu.CompilerParams(vmem_limit_bytes=48 * 1024 * 1024)


def pallas_gcn2(r_matrix, u_feat, v_feat, w1, bu1, bv1, w2, bu2, bv2):
    """Both GraphConvolution layers over ALL users/items in one pallas_call."""
    R, Nu, Nv = r_matrix.shape
    H1 = w1.shape[2]
    H2 = w2.shape[2]
    w1_acc = jnp.cumsum(w1, axis=0)                    # ordinal weight sharing
    w2_acc = jnp.cumsum(w2, axis=0)
    uz, vz = pl.pallas_call(
        _gcn2_kernel,
        out_shape=(jax.ShapeDtypeStruct((Nu, H2), jnp.float32),
                   jax.ShapeDtypeStruct((Nv, H2), jnp.float32)),
        compiler_params=_COMPILER_PARAMS,
    )(r_matrix, u_feat, v_feat,
      w1_acc, bu1.reshape(1, H1), bv1.reshape(1, H1),
      w2_acc, bu2.reshape(1, H2), bv2.reshape(1, H2))
    return uz, vz


def pallas_decoder(u_z, v_z, u_s, v_s, params):
    """Fused denseu1/densev1 + denseu2/densev2 + BilinearMixture decoder."""
    H1 = u_z.shape[1]                                  # hidden[1] (z-block width)
    E = params['w_denseu1'].shape[0]                   # emb_dim
    P = params['P']
    a_mix = params['a_mix']
    NB, H3, _ = P.shape
    C = a_mix.shape[1]
    Bu, Bv = u_z.shape[0], v_z.shape[0]

    # Pre-transpose / split Linear weights once in the wrapper.
    wu1t = jnp.transpose(params['w_denseu1'])                       # (S, E)
    wv1t = jnp.transpose(params['w_densev1'])                       # (S, E)
    wuz_t = jnp.transpose(params['w_denseu2'][:, :H1])              # (H1, H3)
    wuf_t = jnp.transpose(params['w_denseu2'][:, H1:H1 + E])        # (E,  H3)
    wvz_t = jnp.transpose(params['w_densev2'][:, :H1])              # (H1, H3)
    wvf_t = jnp.transpose(params['w_densev2'][:, H1:H1 + E])        # (E,  H3)

    out, m_hat = pl.pallas_call(
        _decoder_kernel,
        out_shape=(jax.ShapeDtypeStruct((Bu, Bv, C), jnp.float32),
                   jax.ShapeDtypeStruct((Bu, Bv), jnp.float32)),
        compiler_params=_COMPILER_PARAMS,
    )(u_z, u_s, v_z, v_s,
      wu1t, params['b_denseu1'].reshape(1, E), wuz_t, wuf_t,
      wv1t, params['b_densev1'].reshape(1, E), wvz_t, wvf_t,
      P, a_mix)
    return out, m_hat


# ------------------------------ GAE forward ------------------------------

def init_params(key, num_classes, num_side, nb, input_dim, emb_dim, hidden):
    ks = jax.random.split(key, 14)
    r = lambda k, s: 0.1 * jax.random.normal(k, s, jnp.float32)
    return dict(
        w_gcl1=r(ks[0], (num_classes, input_dim, hidden[0])),
        bu_gcl1=r(ks[1], (hidden[0],)), bv_gcl1=r(ks[2], (hidden[0],)),
        w_gcl2=r(ks[3], (num_classes, hidden[0], hidden[1])),
        bu_gcl2=r(ks[4], (hidden[1],)), bv_gcl2=r(ks[5], (hidden[1],)),
        w_denseu1=r(ks[6], (emb_dim, num_side)), b_denseu1=r(ks[7], (emb_dim,)),
        w_densev1=r(ks[8], (emb_dim, num_side)), b_densev1=r(ks[9], (emb_dim,)),
        w_denseu2=r(ks[10], (hidden[2], emb_dim + hidden[1])),
        w_densev2=r(ks[11], (hidden[2], emb_dim + hidden[1])),
        P=r(ks[12], (nb, hidden[2], hidden[2])),
        a_mix=r(ks[13], (nb, num_classes)),
    )


def gae_forward(params, u_idx, v_idx, r_matrix,
                u_features, v_features, u_side, v_side):
    # gcl1 + gcl2 fused: adjacency streamed from HBM once, no adj transpose.
    uz2, vz2 = pallas_gcn2(r_matrix, u_features, v_features,
                           params['w_gcl1'], params['bu_gcl1'], params['bv_gcl1'],
                           params['w_gcl2'], params['bu_gcl2'], params['bv_gcl2'])
    u_z = uz2[u_idx]                                   # gather glue (plain JAX)
    v_z = vz2[v_idx]

    # dense side path + bilinear decoder fused in a single kernel.
    output, m_hat = pallas_decoder(u_z, v_z, u_side[u_idx], v_side[v_idx], params)

    # original returns .cpu().detach().numpy(); here we return device arrays
    return output, m_hat, {'user_embedding': u_z, 'item_embedding': v_z}


# --------------------------------- main ---------------------------------

if __name__ == "__main__":
    key = jax.random.PRNGKey(0)
    NUM_USERS, NUM_ITEMS = 16, 24
    NUM_CLASSES, NUM_SIDE, NB = 3, 8, 2
    INPUT_DIM, EMB_DIM = 32, 8
    HIDDEN = (32, 16, 8)

    ks = jax.random.split(key, 8)
    u_features = jax.random.normal(ks[0], (NUM_USERS, INPUT_DIM), jnp.float32)
    v_features = jax.random.normal(ks[1], (NUM_ITEMS, INPUT_DIM), jnp.float32)
    u_side = jax.random.normal(ks[2], (NUM_USERS, NUM_SIDE), jnp.float32)
    v_side = jax.random.normal(ks[3], (NUM_ITEMS, NUM_SIDE), jnp.float32)
    r_matrix = 0.1 * jax.random.uniform(ks[4], (NUM_CLASSES, NUM_USERS, NUM_ITEMS),
                                        jnp.float32)
    u_idx = jnp.arange(8, dtype=jnp.int32)             # batch of users
    v_idx = jnp.arange(12, dtype=jnp.int32)            # batch of items

    params = init_params(ks[5], NUM_CLASSES, NUM_SIDE, NB, INPUT_DIM, EMB_DIM, HIDDEN)

    output, m_hat, emb = gae_forward(params, u_idx, v_idx, r_matrix,
                                     u_features, v_features, u_side, v_side)
    jax.block_until_ready((output, m_hat, emb['user_embedding'], emb['item_embedding']))

    assert output.shape == (8, 12, NUM_CLASSES)
    assert m_hat.shape == (8, 12)
    print("KERNEL_OK")
</pallas_src>

<mosaic_0001>
module attributes {stable_mosaic.version = 11 : i64} {
  func.func @_gcn2_kernel(%arg0: memref<3x16x24xf32, #tpu.memory_space<vmem>>, %arg1: memref<16x32xf32, #tpu.memory_space<vmem>>, %arg2: memref<24x32xf32, #tpu.memory_space<vmem>>, %arg3: memref<3x32x32xf32, #tpu.memory_space<vmem>>, %arg4: memref<1x32xf32, #tpu.memory_space<vmem>>, %arg5: memref<1x32xf32, #tpu.memory_space<vmem>>, %arg6: memref<3x32x16xf32, #tpu.memory_space<vmem>>, %arg7: memref<1x16xf32, #tpu.memory_space<vmem>>, %arg8: memref<1x16xf32, #tpu.memory_space<vmem>>, %arg9: memref<16x16xf32, #tpu.memory_space<vmem>>, %arg10: memref<24x16xf32, #tpu.memory_space<vmem>>) attributes {dimension_semantics = [], scalar_prefetch = 0 : i64, scratch_operands = 0 : i64, tpu.core_type = #tpu.core_type<tc>} {
    %c0 = arith.constant 0 : index
    %c0_0 = arith.constant 0 : index
    %c0_1 = arith.constant 0 : index
    %0 = vector.load %arg0[%c0, %c0_0, %c0_1] : memref<3x16x24xf32, #tpu.memory_space<vmem>>, vector<3x16x24xf32>
    %c0_2 = arith.constant 0 : index
    %c0_3 = arith.constant 0 : index
    %1 = vector.load %arg1[%c0_2, %c0_3] : memref<16x32xf32, #tpu.memory_space<vmem>>, vector<16x32xf32>
    %c0_4 = arith.constant 0 : index
    %c0_5 = arith.constant 0 : index
    %2 = vector.load %arg2[%c0_4, %c0_5] : memref<24x32xf32, #tpu.memory_space<vmem>>, vector<24x32xf32>
    %c0_6 = arith.constant 0 : index
    %c0_7 = arith.constant 0 : index
    %c0_8 = arith.constant 0 : index
    %3 = vector.load %arg3[%c0_6, %c0_7, %c0_8] : memref<3x32x32xf32, #tpu.memory_space<vmem>>, vector<1x32x32xf32>
    %4 = vector.shape_cast %3 : vector<1x32x32xf32> to vector<32x32xf32>
    %cst = arith.constant dense<0.000000e+00> : vector<16x32xf32>
    %5 = tpu.matmul %1, %4, %cst {dimension_numbers = #tpu.dot_dimension_numbers<[1], [0], [0], [1], [0, 0, 1, 1], [], []>} : vector<16x32xf32>, vector<32x32xf32>, vector<16x32xf32> -> vector<16x32xf32>
    %cst_9 = arith.constant dense<0.000000e+00> : vector<24x32xf32>
    %6 = tpu.matmul %2, %4, %cst_9 {dimension_numbers = #tpu.dot_dimension_numbers<[1], [0], [0], [1], [0, 0, 1, 1], [], []>} : vector<24x32xf32>, vector<32x32xf32>, vector<24x32xf32> -> vector<24x32xf32>
    %7 = vector.extract_strided_slice %0 {offsets = [0, 0, 0], sizes = [1, 16, 24], strides = [1, 1, 1]} : vector<3x16x24xf32> to vector<1x16x24xf32>
    %8 = vector.shape_cast %7 : vector<1x16x24xf32> to vector<16x24xf32>
    %cst_10 = arith.constant dense<0.000000e+00> : vector<16x32xf32>
    %9 = tpu.matmul %8, %6, %cst_10 {dimension_numbers = #tpu.dot_dimension_numbers<[1], [0], [0], [1], [0, 0, 1, 1], [], []>} : vector<16x24xf32>, vector<24x32xf32>, vector<16x32xf32> -> vector<16x32xf32>
    %cst_11 = arith.constant dense<0.000000e+00> : vector<24x32xf32>
    %10 = tpu.matmul %8, %5, %cst_11 {dimension_numbers = #tpu.dot_dimension_numbers<[0], [0], [1], [1], [0, 1, 1, 1], [], []>} : vector<16x24xf32>, vector<16x32xf32>, vector<24x32xf32> -> vector<24x32xf32>
    %c1 = arith.constant 1 : index
    %c0_12 = arith.constant 0 : index
    %c0_13 = arith.constant 0 : index
    %11 = vector.load %arg3[%c1, %c0_12, %c0_13] : memref<3x32x32xf32, #tpu.memory_space<vmem>>, vector<1x32x32xf32>
    %12 = vector.shape_cast %11 : vector<1x32x32xf32> to vector<32x32xf32>
    %cst_14 = arith.constant dense<0.000000e+00> : vector<16x32xf32>
    %13 = tpu.matmul %1, %12, %cst_14 {dimension_numbers = #tpu.dot_dimension_numbers<[1], [0], [0], [1], [0, 0, 1, 1], [], []>} : vector<16x32xf32>, vector<32x32xf32>, vector<16x32xf32> -> vector<16x32xf32>
    %cst_15 = arith.constant dense<0.000000e+00> : vector<24x32xf32>
    %14 = tpu.matmul %2, %12, %cst_15 {dimension_numbers = #tpu.dot_dimension_numbers<[1], [0], [0], [1], [0, 0, 1, 1], [], []>} : vector<24x32xf32>, vector<32x32xf32>, vector<24x32xf32> -> vector<24x32xf32>
    %15 = vector.extract_strided_slice %0 {offsets = [1, 0, 0], sizes = [1, 16, 24], strides = [1, 1, 1]} : vector<3x16x24xf32> to vector<1x16x24xf32>
    %16 = vector.shape_cast %15 : vector<1x16x24xf32> to vector<16x24xf32>
    %cst_16 = arith.constant dense<0.000000e+00> : vector<16x32xf32>
    %17 = tpu.matmul %16, %14, %cst_16 {dimension_numbers = #tpu.dot_dimension_numbers<[1], [0], [0], [1], [0, 0, 1, 1], [], []>} : vector<16x24xf32>, vector<24x32xf32>, vector<16x32xf32> -> vector<16x32xf32>
    %cst_17 = arith.constant dense<0.000000e+00> : vector<24x32xf32>
    %18 = tpu.matmul %16, %13, %cst_17 {dimension_numbers = #tpu.dot_dimension_numbers<[0], [0], [1], [1], [0, 1, 1, 1], [], []>} : vector<16x24xf32>, vector<16x32xf32>, vector<24x32xf32> -> vector<24x32xf32>
    %19 = arith.addf %9, %17 : vector<16x32xf32>
    %20 = arith.addf %10, %18 : vector<24x32xf32>
    %c2 = arith.constant 2 : index
    %c0_18 = arith.constant 0 : index
    %c0_19 = arith.constant 0 : index
    %21 = vector.load %arg3[%c2, %c0_18, %c0_19] : memref<3x32x32xf32, #tpu.memory_space<vmem>>, vector<1x32x32xf32>
    %22 = vector.shape_cast %21 : vector<1x32x32xf32> to vector<32x32xf32>
    %cst_20 = arith.constant dense<0.000000e+00> : vector<16x32xf32>
    %23 = tpu.matmul %1, %22, %cst_20 {dimension_numbers = #tpu.dot_dimension_numbers<[1], [0], [0], [1], [0, 0, 1, 1], [], []>} : vector<16x32xf32>, vector<32x32xf32>, vector<16x32xf32> -> vector<16x32xf32>
    %cst_21 = arith.constant dense<0.000000e+00> : vector<24x32xf32>
    %24 = tpu.matmul %2, %22, %cst_21 {dimension_numbers = #tpu.dot_dimension_numbers<[1], [0], [0], [1], [0, 0, 1, 1], [], []>} : vector<24x32xf32>, vector<32x32xf32>, vector<24x32xf32> -> vector<24x32xf32>
    %25 = vector.extract_strided_slice %0 {offsets = [2, 0, 0], sizes = [1, 16, 24], strides = [1, 1, 1]} : vector<3x16x24xf32> to vector<1x16x24xf32>
    %26 = vector.shape_cast %25 : vector<1x16x24xf32> to vector<16x24xf32>
    %cst_22 = arith.constant dense<0.000000e+00> : vector<16x32xf32>
    %27 = tpu.matmul %26, %24, %cst_22 {dimension_numbers = #tpu.dot_dimension_numbers<[1], [0], [0], [1], [0, 0, 1, 1], [], []>} : vector<16x24xf32>, vector<24x32xf32>, vector<16x32xf32> -> vector<16x32xf32>
    %cst_23 = arith.constant dense<0.000000e+00> : vector<24x32xf32>
    %28 = tpu.matmul %26, %23, %cst_23 {dimension_numbers = #tpu.dot_dimension_numbers<[0], [0], [1], [1], [0, 1, 1, 1], [], []>} : vector<16x24xf32>, vector<16x32xf32>, vector<24x32xf32> -> vector<24x32xf32>
    %29 = arith.addf %19, %27 : vector<16x32xf32>
    %30 = arith.addf %20, %28 : vector<24x32xf32>
    %c0_24 = arith.constant 0 : index
    %c0_25 = arith.constant 0 : index
    %31 = vector.load %arg4[%c0_24, %c0_25] : memref<1x32xf32, #tpu.memory_space<vmem>>, vector<1x32xf32>
    %32 = vector.broadcast %31 : vector<1x32xf32> to vector<16x32xf32>
    %33 = arith.addf %29, %32 : vector<16x32xf32>
    %cst_26 = arith.constant 0.000000e+00 : f32
    %34 = vector.broadcast %cst_26 : f32 to vector<16x32xf32>
    %35 = arith.maximumf %33, %34 : vector<16x32xf32>
    %c0_27 = arith.constant 0 : index
    %c0_28 = arith.constant 0 : index
    %36 = vector.load %arg5[%c0_27, %c0_28] : memref<1x32xf32, #tpu.memory_space<vmem>>, vector<1x32xf32>
    %37 = vector.broadcast %36 : vector<1x32xf32> to vector<24x32xf32>
    %38 = arith.addf %30, %37 : vector<24x32xf32>
    %cst_29 = arith.constant 0.000000e+00 : f32
    %39 = vector.broadcast %cst_29 : f32 to vector<24x32xf32>
    %40 = arith.maximumf %38, %39 : vector<24x32xf32>
    %c0_30 = arith.constant 0 : index
    %c0_31 = arith.constant 0 : index
    %c0_32 = arith.constant 0 : index
    %41 = vector.load %arg6[%c0_30, %c0_31, %c0_32] : memref<3x32x16xf32, #tpu.memory_space<vmem>>, vector<1x32x16xf32>
    %42 = vector.shape_cast %41 : vector<1x32x16xf32> to vector<32x16xf32>
    %cst_33 = arith.constant dense<0.000000e+00> : vector<16x16xf32>
    %43 = tpu.matmul %35, %42, %cst_33 {dimension_numbers = #tpu.dot_dimension_numbers<[1], [0], [0], [1], [0, 0, 1, 1], [], []>} : vector<16x32xf32>, vector<32x16xf32>, vector<16x16xf32> -> vector<16x16xf32>
    %cst_34 = arith.constant dense<0.000000e+00> : vector<24x16xf32>
    %44 = tpu.matmul %40, %42, %cst_34 {dimension_numbers = #tpu.dot_dimension_numbers<[1], [0], [0], [1], [0, 0, 1, 1], [], []>} : vector<24x32xf32>, vector<32x16xf32>, vector<24x16xf32> -> vector<24x16xf32>
    %45 = vector.extract_strided_slice %0 {offsets = [0, 0, 0], sizes = [1, 16, 24], strides = [1, 1, 1]} : vector<3x16x24xf32> to vector<1x16x24xf32>
    %46 = vector.shape_cast %45 : vector<1x16x24xf32> to vector<16x24xf32>
    %cst_35 = arith.constant dense<0.000000e+00> : vector<16x16xf32>
    %47 = tpu.matmul %46, %44, %cst_35 {dimension_numbers = #tpu.dot_dimension_numbers<[1], [0], [0], [1], [0, 0, 1, 1], [], []>} : vector<16x24xf32>, vector<24x16xf32>, vector<16x16xf32> -> vector<16x16xf32>
    %cst_36 = arith.constant dense<0.000000e+00> : vector<24x16xf32>
    %48 = tpu.matmul %46, %43, %cst_36 {dimension_numbers = #tpu.dot_dimension_numbers<[0], [0], [1], [1], [0, 1, 1, 1], [], []>} : vector<16x24xf32>, vector<16x16xf32>, vector<24x16xf32> -> vector<24x16xf32>
    %c1_37 = arith.constant 1 : index
    %c0_38 = arith.constant 0 : index
    %c0_39 = arith.constant 0 : index
    %49 = vector.load %arg6[%c1_37, %c0_38, %c0_39] : memref<3x32x16xf32, #tpu.memory_space<vmem>>, vector<1x32x16xf32>
    %50 = vector.shape_cast %49 : vector<1x32x16xf32> to vector<32x16xf32>
    %cst_40 = arith.constant dense<0.000000e+00> : vector<16x16xf32>
    %51 = tpu.matmul %35, %50, %cst_40 {dimension_numbers = #tpu.dot_dimension_numbers<[1], [0], [0], [1], [0, 0, 1, 1], [], []>} : vector<16x32xf32>, vector<32x16xf32>, vector<16x16xf32> -> vector<16x16xf32>
    %cst_41 = arith.constant dense<0.000000e+00> : vector<24x16xf32>
    %52 = tpu.matmul %40, %50, %cst_41 {dimension_numbers = #tpu.dot_dimension_numbers<[1], [0], [0], [1], [0, 0, 1, 1], [], []>} : vector<24x32xf32>, vector<32x16xf32>, vector<24x16xf32> -> vector<24x16xf32>
    %53 = vector.extract_strided_slice %0 {offsets = [1, 0, 0], sizes = [1, 16, 24], strides = [1, 1, 1]} : vector<3x16x24xf32> to vector<1x16x24xf32>
    %54 = vector.shape_cast %53 : vector<1x16x24xf32> to vector<16x24xf32>
    %cst_42 = arith.constant dense<0.000000e+00> : vector<16x16xf32>
    %55 = tpu.matmul %54, %52, %cst_42 {dimension_numbers = #tpu.dot_dimension_numbers<[1], [0], [0], [1], [0, 0, 1, 1], [], []>} : vector<16x24xf32>, vector<24x16xf32>, vector<16x16xf32> -> vector<16x16xf32>
    %cst_43 = arith.constant dense<0.000000e+00> : vector<24x16xf32>
    %56 = tpu.matmul %54, %51, %cst_43 {dimension_numbers = #tpu.dot_dimension_numbers<[0], [0], [1], [1], [0, 1, 1, 1], [], []>} : vector<16x24xf32>, vector<16x16xf32>, vector<24x16xf32> -> vector<24x16xf32>
    %57 = arith.addf %47, %55 : vector<16x16xf32>
    %58 = arith.addf %48, %56 : vector<24x16xf32>
    %c2_44 = arith.constant 2 : index
    %c0_45 = arith.constant 0 : index
    %c0_46 = arith.constant 0 : index
    %59 = vector.load %arg6[%c2_44, %c0_45, %c0_46] : memref<3x32x16xf32, #tpu.memory_space<vmem>>, vector<1x32x16xf32>
    %60 = vector.shape_cast %59 : vector<1x32x16xf32> to vector<32x16xf32>
    %cst_47 = arith.constant dense<0.000000e+00> : vector<16x16xf32>
    %61 = tpu.matmul %35, %60, %cst_47 {dimension_numbers = #tpu.dot_dimension_numbers<[1], [0], [0], [1], [0, 0, 1, 1], [], []>} : vector<16x32xf32>, vector<32x16xf32>, vector<16x16xf32> -> vector<16x16xf32>
    %cst_48 = arith.constant dense<0.000000e+00> : vector<24x16xf32>
    %62 = tpu.matmul %40, %60, %cst_48 {dimension_numbers = #tpu.dot_dimension_numbers<[1], [0], [0], [1], [0, 0, 1, 1], [], []>} : vector<24x32xf32>, vector<32x16xf32>, vector<24x16xf32> -> vector<24x16xf32>
    %63 = vector.extract_strided_slice %0 {offsets = [2, 0, 0], sizes = [1, 16, 24], strides = [1, 1, 1]} : vector<3x16x24xf32> to vector<1x16x24xf32>
    %64 = vector.shape_cast %63 : vector<1x16x24xf32> to vector<16x24xf32>
    %cst_49 = arith.constant dense<0.000000e+00> : vector<16x16xf32>
    %65 = tpu.matmul %64, %62, %cst_49 {dimension_numbers = #tpu.dot_dimension_numbers<[1], [0], [0], [1], [0, 0, 1, 1], [], []>} : vector<16x24xf32>, vector<24x16xf32>, vector<16x16xf32> -> vector<16x16xf32>
    %cst_50 = arith.constant dense<0.000000e+00> : vector<24x16xf32>
    %66 = tpu.matmul %64, %61, %cst_50 {dimension_numbers = #tpu.dot_dimension_numbers<[0], [0], [1], [1], [0, 1, 1, 1], [], []>} : vector<16x24xf32>, vector<16x16xf32>, vector<24x16xf32> -> vector<24x16xf32>
    %67 = arith.addf %57, %65 : vector<16x16xf32>
    %68 = arith.addf %58, %66 : vector<24x16xf32>
    %c0_51 = arith.constant 0 : index
    %c0_52 = arith.constant 0 : index
    %69 = vector.load %arg7[%c0_51, %c0_52] : memref<1x16xf32, #tpu.memory_space<vmem>>, vector<1x16xf32>
    %70 = vector.broadcast %69 : vector<1x16xf32> to vector<16x16xf32>
    %71 = arith.addf %67, %70 : vector<16x16xf32>
    %cst_53 = arith.constant 0.000000e+00 : f32
    %72 = vector.broadcast %cst_53 : f32 to vector<16x16xf32>
    %73 = arith.maximumf %71, %72 : vector<16x16xf32>
    %c0_54 = arith.constant 0 : index
    %c0_55 = arith.constant 0 : index
    %74 = vector.load %arg8[%c0_54, %c0_55] : memref<1x16xf32, #tpu.memory_space<vmem>>, vector<1x16xf32>
    %75 = vector.broadcast %74 : vector<1x16xf32> to vector<24x16xf32>
    %76 = arith.addf %68, %75 : vector<24x16xf32>
    %cst_56 = arith.constant 0.000000e+00 : f32
    %77 = vector.broadcast %cst_56 : f32 to vector<24x16xf32>
    %78 = arith.maximumf %76, %77 : vector<24x16xf32>
    %c0_57 = arith.constant 0 : index
    %c0_58 = arith.constant 0 : index
    %79 = vector.load %arg9[%c0_57, %c0_58] : memref<16x16xf32, #tpu.memory_space<vmem>>, vector<16x16xf32>
    tpu.vector_store %arg9[%c0_57, %c0_58], %73 {strides = array<i32>} : memref<16x16xf32, #tpu.memory_space<vmem>>, vector<16x16xf32>,
    %c0_59 = arith.constant 0 : index
    %c0_60 = arith.constant 0 : index
    %80 = vector.load %arg10[%c0_59, %c0_60] : memref<24x16xf32, #tpu.memory_space<vmem>>, vector<24x16xf32>
    tpu.vector_store %arg10[%c0_59, %c0_60], %78 {strides = array<i32>} : memref<24x16xf32, #tpu.memory_space<vmem>>, vector<24x16xf32>,
    return
  }
}

</mosaic_0001>

<bundles_post_ra>
// kernel: tpu_custom_call.1
= control target key start
LH: loop header
LB: loop body
LE: loop exit
PB: predicated region body
PF: predicated region fallthrough
CT: control target
= control target key end

     0   :  { %16 = vsyncpa [#allocation3], 0  ;;  %s3433_s0 = inlined_call_operand.vmem [shape: f32[3,16,24], index: 0, kind: input, shape index: {}]   ;;  %s3434_s1 = inlined_call_operand.hbm [shape: f32[16,32], index: 1, kind: input, shape index: {}]   ;;  %s3435_s2 = inlined_call_operand.hbm [shape: f32[24,32], index: 2, kind: input, shape index: {}]   ;;  %s3436_s3 = inlined_call_operand.vmem [shape: f32[3,32,32], index: 3, kind: input, shape index: {}]   ;;  %s3437_s4 = inlined_call_operand.vmem [shape: f32[1,32], index: 4, kind: input, shape index: {}]   ;;  %s3438_s5 = inlined_call_operand.vmem [shape: f32[1,32], index: 5, kind: input, shape index: {}]   ;;  %s3439_s6 = inlined_call_operand.vmem [shape: f32[3,32,16], index: 6, kind: input, shape index: {}]   ;;  %s3440_s7 = inlined_call_operand.vmem [shape: f32[1,16], index: 7, kind: input, shape index: {}]   ;;  %s3441_s8 = inlined_call_operand.vmem [shape: f32[1,16], index: 8, kind: input, shape index: {}]   ;;  %s3442_s9 = inlined_call_operand.hbm [shape: f32[16,16], index: 9, kind: output, shape index: {0}]   ;;  %s3443_s10 = inlined_call_operand.vmem [shape: f32[24,16], index: 10, kind: output, shape index: {1}]  }
   0x1   :  { %17 = vsyncpa [#allocation6], 0 }
   0x2   :  { %18 = vsyncpa [#allocation4], 0  ;;  %s2953_s13 = smov [#allocation2]   ;;  %s2881_s17 = scalar_lea.hbm %s3434_s1, 256 }
   0x3   :  { %s26_s14 = sshll.u32 %s2953_s13, 4  ;;  %p2882_p0 = scmp.ne.s32.totalorder %s3434_s1, %s2881_s17  ;;  %s27_s14 = int_to_ptr.vmem [resolvable:$true] %s26_s14 }
   0x4   :  { %p2885_p1 = scmp.lt.u32.totalorder %s2881_s17, %s3434_s1 }
   0x6   :  { %p2887_p2 = pnand %p2885_p1, %p2882_p0 }
   0x8   :  { %2890 = shalt.err (!%p2887_p2)
}
   0x9   :  { %s2891_s22 = scalar_lea.vmem %s27_s14, 256  ;;  %p2896_p4 = scmp.lt.s32.totalorder %s27_s14, %s27_s14 }
   0xa   :  { %p2892_p3 = scmp.ne.s32.totalorder %s27_s14, %s2891_s22  ;;  %p2897_p5 = scmp.lt.s32.totalorder %s2891_s22, %s2891_s22 }
   0xc   :  { %p2898_p6 = por %p2897_p5, %p2896_p4 }
   0xe   :  { %p2899_p7 = pnand %p2898_p6, %p2892_p3 }
  0x10   :  { %2902 = shalt.err (!%p2899_p7)
}
  0x11   :  { %s2954_s23 = smov 128   ;;  %s2955_s24 = smov 8  }
  0x12   :  { %32 = dma.hbm_to_vmem [thread:$0]  %s3434_s1, 256, %s27_s14, [#allocation3], %s2954_s23, %s2954_s23, %s2955_s24  }
  0x13   :  { %s2956_s27 = smov [#allocation5]   ;;  %s2903_s11 = scalar_lea.hbm %s3435_s2, 384 }
  0x14   :  { %s38_s28 = sshll.u32 %s2956_s27, 4  ;;  %p2904_p8 = scmp.ne.s32.totalorder %s3435_s2, %s2903_s11  ;;  %s39_s28 = int_to_ptr.vmem [resolvable:$true] %s38_s28 }
  0x15   :  { %p2907_p9 = scmp.lt.u32.totalorder %s2903_s11, %s3435_s2 }
  0x17   :  { %p2909_p10 = pnand %p2907_p9, %p2904_p8 }
  0x19   :  { %2912 = shalt.err (!%p2909_p10)
}
  0x1a   :  { %s2913_s17 = scalar_lea.vmem %s39_s28, 384  ;;  %p2918_p12 = scmp.lt.s32.totalorder %s39_s28, %s39_s28 }
  0x1b   :  { %p2914_p11 = scmp.ne.s32.totalorder %s39_s28, %s2913_s17  ;;  %p2919_p13 = scmp.lt.s32.totalorder %s2913_s17, %s2913_s17 }
  0x1d   :  { %p2920_p0 = por %p2919_p13, %p2918_p12 }
  0x1f   :  { %p2921_p1 = pnand %p2920_p0, %p2914_p11 }
  0x21   :  { %2924 = shalt.err (!%p2921_p1)
}
  0x22   :  { %44 = dma.hbm_to_vmem [thread:$0]  %s3435_s2, 384, %s39_s28, [#allocation6], %s2954_s23, %s2954_s23, %s2955_s24  }
  0x23   :  { %2947 = dma.done.wait [#allocation3], 256  }
  0x24   :  { %2948 = vsyncadd [#allocation3], 4294967040 }
  0x25   :  { %2949 = dma.done.wait [#allocation6], 384  }
  0x26   :  { %2950 = vsyncadd [#allocation6], 4294966912  ;;  %v2957_v0 = vmov 0.0|0.0   ;;  %vm2958_vm0 = vmmov 0   ;;  %v2959_v1 = vmov 0.0   ;;  %vm78_vm1 = vcmask 261120  }
  0x27   :  { %2747 = vmatprep.subr.bf16.mxu1 %v2957_v0  ;;  %2458 = vmatprep.mubr.msk.f32.mxu1 %vm2958_vm0, %v2959_v1  ;;  %v74_v2 = vld [vmem:[%s3436_s3] sm:$0xff]  ;;  %v75_v3 = vld [vmem:[%s3436_s3 + $0x8] sm:$0xff]  ;;  %v76_v4 = vld [vmem:[%s3436_s3 + $0x10] sm:$0xff]  ;;  %vm409_vm2 = vcmask 195584   ;;  %vm523_vm3 = vcmask 130048   ;;  %s2960_s25 = smov [#allocation7]  }
  0x28   :  { %v2739_v5 = vpack.c.bf16 %v75_v3, %v74_v2  ;;  %v77_v6 = vld [vmem:[%s3436_s3 + $0x18] sm:$0xff]  ;;  %v3061_v7 = vld [vmem:[#allocation2] sm:$0xff]  ;;  %v2227_v10 = vld [vmem:[%s3436_s3 + $0x28] sm:$0xff]  ;;  %s2204_s26 = sshll.u32 %s2960_s25, 4  ;;  %s2205_s26 = int_to_ptr.vmem [resolvable:$true] %s2204_s26 }
  0x29   :  { %v2743_v8 = vpack.c.bf16 %v77_v6, %v76_v4  ;;  %2447 = vmatprep.mubr.msk.f32.mxu0 %vm78_vm1, %v3061_v7  ;;  %v2226_v9 = vld [vmem:[%s3436_s3 + $0x20] sm:$0xff]  ;;  %v3081_v12 = vld [vmem:[%s3433_s0 + $0x10] sm:$0xff]  ;;  %v3086_v13 = vld [vmem:[%s3433_s0 + $0x8] sm:$0xff]  ;;  %p2930_p3 = scmp.lt.s32.totalorder %s2205_s26, %s2205_s26 }
  0x2a   :  { %2740 = vmatprep.subr.bf16.mxu0 %v2739_v5  ;;  %2749 = vmatpush3.bf16.msra.mxu1 %v2739_v5  ;;  %v3075_v11 = vld [vmem:[%s3433_s0] sm:$0xff]  ;;  %v3089_v14 = vld [vmem:[#allocation5] sm:$0xff]  ;;  %v2753_v15 = vpack.c.bf16 %v2227_v10, %v2226_v9  ;;  %v3094_v16 = vld [vmem:[%s3433_s0 + $0x18] sm:$0xff] }
  0x2b   :  { %2742 = vmatpush3.bf16.msra.mxu0 %v2739_v5  ;;  %2750 = vmatprep.subr.bf16.mxu1 %v2957_v0  ;;  %v3096_v17 = vld [vmem:[#allocation2 + $0x8] sm:$0xff]  ;;  %v2228_v18 = vld [vmem:[%s3436_s3 + $0x30] sm:$0xff]  ;;  %v2229_v19 = vld [vmem:[%s3436_s3 + $0x38] sm:$0xff] }
  0x2c   :  { %2744 = vmatprep.subr.bf16.mxu0 %v2743_v8  ;;  %694 = vxpose.xlu1.b32.start [1/2] (short) (narrow) %v3075_v11, 24  ;;  %v3113_v20 = vld [vmem:[#allocation5 + $0x8] sm:$0xff]  ;;  %v2757_v21 = vpack.c.bf16 %v2229_v19, %v2228_v18  ;;  %v3122_v22 = vld [vmem:[#allocation5 + $0x10] sm:$0xff]  ;;  %v3154_v24 = vld [vmem:[%s3433_s0 + $0x28] sm:$0xff] }
  0x2d   :  { %491 = vxpose.xlu0.b32.start [1/2] (short) (narrow) %v3081_v12, 24  ;;  %v3148_v23 = vld [vmem:[%s3433_s0 + $0x20] sm:$0xff]  ;;  %v2246_v26 = vld [vmem:[%s3436_s3 + $0x48] sm:$0xff]  ;;  %v2247_v34 = vld [vmem:[%s3436_s3 + $0x50] sm:$0xff] }
  0x2e   :  { %2752 = vmatpush3.bf16.msra.mxu1 %v2743_v8  ;;  %v2245_v25 = vld [vmem:[%s3436_s3 + $0x40] sm:$0xff]  ;;  %v2248_v35 = vld [vmem:[%s3436_s3 + $0x58] sm:$0xff] }
  0x2f   :  { %2746 = vmatpush3.bf16.msra.mxu0 %v2743_v8  ;;  %2761 = vmatprep.subr.bf16.mxu1 %v2957_v0  ;;  %v2781_v32 = vpack.c.bf16 %v2246_v26, %v2245_v25  ;;  %v2785_v39 = vpack.c.bf16 %v2248_v35, %v2247_v34  ;;  %v1209_v34 = vld [vmem:[%s3439_s6 + $0x18] sm:$0xff] }
  0x30   :  { %2754 = vmatprep.subr.bf16.mxu0 %v2753_v15  ;;  %695 = vxpose.xlu1.b32.end [2/2] (short) (narrow) %v3086_v13, 24 }
  0x31   :  { %2459 = vmatmul.mubr.msk.f32.vlgmr.msra.gmra.mrb[0].mxu1 %vm78_vm1, %v3089_v14  ;;  %492 = vxpose.xlu0.b32.end [2/2] (short) (narrow) %v3094_v16, 24 }
  0x32   :  { %2448 = vmatmul.mubr.msk.f32.vlgmr.msra.gmra.mrb[0].mxu0 %vm78_vm1, %v3096_v17  ;;  %2461 = vmatprep.mubr.msk.f32.mxu1 %vm2958_vm0, %v2959_v1 }
  0x33   :  { %2763 = vmatpush3.bf16.msra.mxu1 %v2753_v15  ;;  %2756 = vmatpush3.bf16.msra.mxu0 %v2753_v15 }
  0x34   :  { %2764 = vmatprep.subr.bf16.mxu1 %v2957_v0  ;;  %2758 = vmatprep.subr.bf16.mxu0 %v2757_v21 }
  0x35   :  { %2462 = vmatmul.mubr.msk.f32.gmra.mrb[2].mxu1 %vm78_vm1, %v3113_v20  ;;  %2475 = vmatprep.mubr.msk.f32.mxu0 %vm78_vm1, %v3061_v7 }
  0x36   :  { %2464 = vmatprep.mubr.msk.f32.mxu1 %vm2958_vm0, %v2959_v1  ;;  %1056 = vxpose.xlu0.b32.start [1/2] (short) (narrow) %v3148_v23, 24 }
  0x37   :  { %2766 = vmatpush3.bf16.msra.mxu1 %v2757_v21  ;;  %2760 = vmatpush3.bf16.msra.mxu0 %v2757_v21 }
  0x38   :  { %2778 = vmatprep.subr.bf16.mxu1 %v2957_v0 }
  0x39   :  { %2465 = vmatmul.mubr.msk.f32.gmra.mrb[4].mxu1 %vm78_vm1, %v3122_v22 }
  0x3a   :  { %2486 = vmatprep.mubr.msk.f32.mxu1 %vm2958_vm0, %v2959_v1  ;;  %2476 = vmatmul.mubr.msk.f32.vlgmr.msra.gmra.mrb[2].mxu0 %vm78_vm1, %v3096_v17 }
  0x3b   :  { %2501 = vmatprep.mubr.msk.f32.mxu0 %vm409_vm2, %v3081_v12  ;;  %1057 = vxpose.xlu0.b32.end [2/2] (short) (narrow) %v3154_v24, 24 }
  0x3d   :  { %2487 = vmatmul.mubr.msk.f32.vlgmr.msra.gmra.mrb[6].mxu1 %vm78_vm1, %v3089_v14 }
  0x3e   :  { %2489 = vmatprep.mubr.msk.f32.mxu1 %vm2958_vm0, %v2959_v1 }
  0x41   :  { %2490 = vmatmul.mubr.msk.f32.gmra.mrb[8].mxu1 %vm78_vm1, %v3113_v20 }
  0x42   :  { %2492 = vmatprep.mubr.msk.f32.mxu1 %vm2958_vm0, %v2959_v1 }
  0x45   :  { %2493 = vmatmul.mubr.msk.f32.gmra.mrb[10].mxu1 %vm78_vm1, %v3122_v22 }
  0x46   :  { %2530 = vmatprep.mubr.msk.f32.mxu1 %vm2958_vm0, %v2959_v1 }
  0xac   :  { %v3163_v28 = vpop.trf.xlu1 }
  0xad   :  { %v3192_v54 = vpop.trf.xlu0 }
  0xb0   :  { %v3171_v40 = vpop.trf.xlu1 }
  0xb1   :  { %v3199_v55 = vpop.trf.xlu0 }
  0xb4   :  { %v3181_v48 = vpop.trf.xlu1 }
  0xb5   :  { %v3207_v56 = vpop.trf.xlu0 }
  0xb9   :  { %v3233_v2 = vpop.trf.xlu0 }
  0xbd   :  { %v3235_v5 = vpop.trf.xlu0 }
  0xc1   :  { %v3243_v9 = vpop.trf.xlu0 }
 0x104   :  { %v235_v27 = vpop.f32.mrb[0].mxu1 }
 0x105   :  { %v2449_v29 = vpop.f32.mrb[0].mxu0  ;;  %v2460_v30 = vpop.f32.mrb[1].mxu1 }
 0x106   :  { %v151_v31 = vpop.f32.mrb[1].mxu0  ;;  %v1206_v30 = vld [vmem:[%s3439_s6] sm:$0xff] }
 0x107   :  { %v2779_v33 = vpack.c.bf16 %v2449_v29, %v151_v31  ;;  %v1207_v31 = vld [vmem:[%s3439_s6 + $0x8] sm:$0xff] }
 0x108   :  { %v240_v36 = vpop.f32.mrb[2].mxu1 }
 0x109   :  { %v2774_v37 = vpack.c.bf16 %v240_v36, %v235_v27  ;;  %v2463_v38 = vpop.f32.mrb[3].mxu1  ;;  %2780 = vmatpush3.bf16.msra.mxu1 %v2779_v33  ;;  %v1208_v33 = vld [vmem:[%s3439_s6 + $0x10] sm:$0xff]  ;;  %v2266_v36 = vld [vmem:[%s3439_s6 + $0x20] sm:$0xff] }
 0x10a   :  { %2782 = vmatprep.subr.bf16.mxu1 %v2781_v32  ;;  %v2806_v35 = vpack.c.bf16 %v1209_v34, %v1208_v33 }
 0x10c   :  { %v245_v41 = vpop.f32.mrb[4].mxu1  ;;  %2531 = vmatmul.mubr.msk.f32.vlgmr.msra.gmra.mrb[12].mxu1 %vm523_vm3, %v3163_v28 }
 0x10d   :  { %v2466_v42 = vpop.f32.mrb[5].mxu1  ;;  %2533 = vmatprep.mubr.msk.f32.mxu1 %vm2958_vm0, %v2959_v1  ;;  %2784 = vmatpush3.bf16.msra.mxu1 %v2781_v32  ;;  %v2477_v43 = vpop.f32.mrb[2].mxu0 }
 0x10e   :  { %2786 = vmatprep.subr.bf16.mxu1 %v2785_v39  ;;  %v320_v44 = vpop.f32.mrb[3].mxu0 }
 0x10f   :  { %v2772_v45 = vpack.c.bf16 %v2477_v43, %v320_v44 }
 0x110   :  { %v395_v46 = vpop.f32.mrb[6].mxu1  ;;  %2534 = vmatmul.mubr.msk.f32.gmra.mrb[14].mxu1 %vm523_vm3, %v3171_v40 }
 0x111   :  { %v2488_v47 = vpop.f32.mrb[7].mxu1  ;;  %2536 = vmatprep.mubr.msk.f32.mxu1 %vm2958_vm0, %v2959_v1  ;;  %2788 = vmatpush3.bf16.msra.mxu1 %v2785_v39 }
 0x112   :  { %2799 = vmatprep.subr.bf16.mxu1 %v2957_v0 }
 0x114   :  { %v400_v49 = vpop.f32.mrb[8].mxu1  ;;  %2537 = vmatmul.mubr.msk.f32.gmra.mrb[16].mxu1 %vm523_vm3, %v3181_v48 }
 0x115   :  { %v2767_v50 = vpack.c.bf16 %v400_v49, %v395_v46  ;;  %v2491_v51 = vpop.f32.mrb[9].mxu1  ;;  %2547 = vmatprep.mubr.msk.f32.mxu1 %vm78_vm1, %v3061_v7 }
 0x117   :  { %2768 = vmatprep.subr.bf16.mxu0 %v2767_v50 }
 0x118   :  { %2770 = vmatpush3.bf16.msra.mxu0 %v2767_v50  ;;  %2548 = vmatmul.mubr.msk.f32.vlgmr.msra.gmra.mrb[18].mxu1 %vm78_vm1, %v3096_v17  ;;  %v405_v52 = vpop.f32.mrb[10].mxu1 }
 0x119   :  { %v2494_v53 = vpop.f32.mrb[11].mxu1  ;;  %2499 = vmatprep.subr.mxu0 %v405_v52  ;;  %2580 = vmatprep.mubr.msk.f32.mxu1 %vm2958_vm0, %v2959_v1 }
 0x11c   :  { %2500 = vmatpush3.msra.mxu0 %v405_v52 }
 0x11d   :  { %2502 = vmatmul.mubr.msk.f32.vlgmr.msra.gmra.mrb[4].mxu0 %vm409_vm2, %v3094_v16  ;;  %2771 = vmatprep.subr.bf16.mxu0 %v2957_v0 }
 0x11e   :  { %2773 = vmatpush3.bf16.msra.mxu0 %v2772_v45  ;;  %2508 = vmatprep.mubr.msk.f32.mxu0 %vm2958_vm0, %v2959_v1 }
 0x11f   :  { %2775 = vmatprep.subr.bf16.mxu0 %v2774_v37 }
 0x121   :  { %2509 = vmatmul.mubr.msk.f32.vlgmr.msra.gmra.mrb[6].mxu0 %vm523_vm3, %v3192_v54 }
 0x122   :  { %2777 = vmatpush3.bf16.msra.mxu0 %v2774_v37  ;;  %2511 = vmatprep.mubr.msk.f32.mxu0 %vm2958_vm0, %v2959_v1  ;;  %v2267_v37 = vld [vmem:[%s3439_s6 + $0x28] sm:$0xff] }
 0x123   :  { %2521 = vmatprep.subr.mxu0 %v245_v41  ;;  %v2816_v38 = vpack.c.bf16 %v2267_v37, %v2266_v36 }
 0x125   :  { %2512 = vmatmul.mubr.msk.f32.gmra.mrb[8].mxu0 %vm523_vm3, %v3199_v55 }
 0x126   :  { %2522 = vmatpush3.msra.mxu0 %v245_v41  ;;  %2514 = vmatprep.mubr.msk.f32.mxu0 %vm2958_vm0, %v2959_v1  ;;  %v2260_v41 = vld [vmem:[%s3438_s5] ss:$0 sm:$0xff]  ;;  %s2925_s5 = scalar_lea.vmem %s2205_s26, 256 }
 0x127   :  { %2789 = vmatprep.subr.bf16.mxu0 %v2957_v0  ;;  %p2926_p2 = scmp.ne.s32.totalorder %s2205_s26, %s2925_s5  ;;  %p2931_p4 = scmp.lt.s32.totalorder %s2925_s5, %s2925_s5 }
 0x129   :  { %2515 = vmatmul.mubr.msk.f32.gmra.mrb[10].mxu0 %vm523_vm3, %v3207_v56  ;;  %p2932_p5 = por %p2931_p4, %p2930_p3 }
 0x12a   :  { %2523 = vmatprep.mubr.msk.f32.mxu0 %vm409_vm2, %v3075_v11 }
 0x12b   :  { %p2933_p6 = pnand %p2932_p5, %p2926_p2 }
 0x12d   :  { %2524 = vmatmul.mubr.msk.f32.vlgmr.msra.gmra.mrb[4].mxu0 %vm409_vm2, %v3086_v13 }
 0x12e   :  { %2791 = vmatpush3.bf16.msra.mxu0 %v2781_v32  ;;  %2558 = vmatprep.mubr.msk.f32.mxu0 %vm2958_vm0, %v2959_v1  ;;  %v2802_v32 = vpack.c.bf16 %v1207_v31, %v1206_v30  ;;  %v2287_v30 = vld [vmem:[%s3439_s6 + $0x50] sm:$0xff]  ;;  %v2288_v31 = vld [vmem:[%s3439_s6 + $0x58] sm:$0xff] }
 0x12f   :  { %2792 = vmatprep.subr.bf16.mxu0 %v2957_v0 }
 0x132   :  { %2794 = vmatpush3.bf16.msra.mxu0 %v2785_v39 }
 0x135   :  { %2559 = vmatmul.mubr.msk.f32.vlgmr.msra.gmra.mrb[12].mxu0 %vm78_vm1, %v3089_v14 }
 0x136   :  { %2561 = vmatprep.mubr.msk.f32.mxu0 %vm2958_vm0, %v2959_v1 }
 0x139   :  { %2562 = vmatmul.mubr.msk.f32.gmra.mrb[14].mxu0 %vm78_vm1, %v3113_v20 }
 0x13a   :  { %2564 = vmatprep.mubr.msk.f32.mxu0 %vm2958_vm0, %v2959_v1 }
 0x13d   :  { %2565 = vmatmul.mubr.msk.f32.gmra.mrb[16].mxu0 %vm78_vm1, %v3122_v22 }
 0x13e   :  { %2573 = vmatprep.mubr.msk.f32.mxu0 %vm409_vm2, %v3148_v23 }
 0x1df   :  { %v801_v57 = vpop.f32.mrb[12].mxu1 }
 0x1e0   :  { %v2532_v58 = vpop.f32.mrb[13].mxu1 }
 0x1e3   :  { %v806_v59 = vpop.f32.mrb[14].mxu1 }
 0x1e4   :  { %v2535_v60 = vpop.f32.mrb[15].mxu1 }
 0x1e5   :  { %v2259_v60 = vld [vmem:[%s3437_s4] ss:$0 sm:$0xff] }
 0x1e7   :  { %v811_v61 = vpop.f32.mrb[16].mxu1 }
 0x1e8   :  { %v2538_v62 = vpop.f32.mrb[17].mxu1 }
 0x1eb   :  { %v2549_v63 = vpop.f32.mrb[18].mxu1 }
 0x1ec   :  { %v886_v3 = vpop.f32.mrb[19].mxu1 }
 0x1ed   :  { %v2800_v4 = vpack.c.bf16 %v2549_v63, %v886_v3 }
 0x1ef   :  { %2801 = vmatpush3.bf16.msra.mxu1 %v2800_v4  ;;  %v2268_v4 = vld [vmem:[%s3439_s6 + $0x30] sm:$0xff] }
 0x1f0   :  { %2803 = vmatprep.subr.bf16.mxu1 %v2802_v32 }
 0x1f2   :  { %2581 = vmatmul.mubr.msk.f32.vlgmr.msra.gmra.mrb[20].mxu1 %vm523_vm3, %v3233_v2 }
 0x1f3   :  { %2583 = vmatprep.mubr.msk.f32.mxu1 %vm2958_vm0, %v2959_v1  ;;  %2805 = vmatpush3.bf16.msra.mxu1 %v2802_v32 }
 0x1f4   :  { %v599_v6 = vpop.f32.mrb[6].mxu0  ;;  %2807 = vmatprep.subr.bf16.mxu1 %v2806_v35 }
 0x1f5   :  { %v802_v7 = vadd.f32 %v801_v57, %v599_v6  ;;  %v2510_v8 = vpop.f32.mrb[7].mxu0  ;;  %v2269_v6 = vld [vmem:[%s3439_s6 + $0x38] sm:$0xff] }
 0x1f6   :  { %2584 = vmatmul.mubr.msk.f32.gmra.mrb[22].mxu1 %vm523_vm3, %v3235_v5 }
 0x1f7   :  { %2586 = vmatprep.mubr.msk.f32.mxu1 %vm2958_vm0, %v2959_v1  ;;  %2809 = vmatpush3.bf16.msra.mxu1 %v2806_v35 }
 0x1f8   :  { %v604_v10 = vpop.f32.mrb[8].mxu0  ;;  %2817 = vmatprep.subr.bf16.mxu1 %v2816_v38 }
 0x1f9   :  { %v807_v14 = vadd.f32 %v806_v59, %v604_v10  ;;  %v2513_v15 = vpop.f32.mrb[9].mxu0  ;;  %v2820_v10 = vpack.c.bf16 %v2269_v6, %v2268_v4 }
 0x1fa   :  { %2587 = vmatmul.mubr.msk.f32.gmra.mrb[24].mxu1 %vm523_vm3, %v3243_v9 }
 0x1fc   :  { %v609_v17 = vpop.f32.mrb[10].mxu0 }
 0x1fd   :  { %v812_v18 = vadd.f32 %v811_v61, %v609_v17  ;;  %v2516_v19 = vpop.f32.mrb[11].mxu0 }
 0x208   :  { %v961_v20 = vpop.f32.mrb[12].mxu0 }
 0x209   :  { %v2560_v21 = vpop.f32.mrb[13].mxu0 }
 0x20a   :  { %v2285_v21 = vld [vmem:[%s3439_s6 + $0x40] sm:$0xff] }
 0x20c   :  { %v966_v22 = vpop.f32.mrb[14].mxu0 }
 0x20d   :  { %v2795_v25 = vpack.c.bf16 %v966_v22, %v961_v20  ;;  %v2563_v26 = vpop.f32.mrb[15].mxu0  ;;  %v2286_v22 = vld [vmem:[%s3439_s6 + $0x48] sm:$0xff] }
 0x20f   :  { %2796 = vmatprep.subr.bf16.mxu0 %v2795_v25 }
 0x210   :  { %2798 = vmatpush3.bf16.msra.mxu0 %v2795_v25  ;;  %v971_v27 = vpop.f32.mrb[16].mxu0 }
 0x211   :  { %v2566_v29 = vpop.f32.mrb[17].mxu0  ;;  %2571 = vmatprep.subr.mxu0 %v971_v27 }
 0x214   :  { %2572 = vmatpush3.msra.mxu0 %v971_v27  ;;  %v2844_v27 = vpack.c.bf16 %v2286_v22, %v2285_v21 }
 0x215   :  { %2574 = vmatmul.mubr.msk.f32.vlgmr.msra.gmra.mrb[4].mxu0 %vm409_vm2, %v3154_v24  ;;  %2810 = vmatprep.subr.bf16.mxu0 %v2957_v0 }
 0x216   :  { %2608 = vmatprep.mubr.msk.f32.mxu0 %vm2958_vm0, %v2959_v1  ;;  %2812 = vmatpush3.bf16.msra.mxu0 %v2802_v32  ;;  %v2848_v32 = vpack.c.bf16 %v2288_v31, %v2287_v30 }
 0x217   :  { %2813 = vmatprep.subr.bf16.mxu0 %v2957_v0 }
 0x21a   :  { %2815 = vmatpush3.bf16.msra.mxu0 %v2806_v35 }
 0x2c5   :  { %v1163_v39 = vpop.f32.mrb[20].mxu1 }
 0x2c6   :  { %v1179_v42 = vadd.f32 %v1163_v39, %v802_v7  ;;  %v2582_v43 = vpop.f32.mrb[21].mxu1 }
 0x2c8   :  { %v1200_v44 = vadd.f32 %v2260_v41, %v1179_v42 }
 0x2c9   :  { %v1168_v45 = vpop.f32.mrb[22].mxu1 }
 0x2ca   :  { %v3276_v46 = vmax.f32 %v1200_v44, 0.0  ;;  %v1180_v47 = vadd.f32 %v1168_v45, %v807_v14  ;;  %v2585_v49 = vpop.f32.mrb[23].mxu1 }
 0x2cc   :  { %v1201_v50 = vadd.f32 %v2260_v41, %v1180_v47  ;;  %2609 = vmatmul.mubr.msk.f32.vlgmr.msra.gmra.mrb[18].mxu0 %vm78_vm1, %v3276_v46 }
 0x2cd   :  { %v1173_v51 = vpop.f32.mrb[24].mxu1  ;;  %2611 = vmatprep.mubr.msk.f32.mxu0 %vm2958_vm0, %v2959_v1 }
 0x2ce   :  { %v3282_v52 = vmax.f32 %v1201_v50, 0.0  ;;  %v1181_v53 = vadd.f32 %v1173_v51, %v812_v18  ;;  %v2588_v57 = vpop.f32.mrb[25].mxu1 }
 0x2d0   :  { %v1202_v58 = vadd.f32 %v2260_v41, %v1181_v53  ;;  %2612 = vmatmul.mubr.msk.f32.gmra.mrb[20].mxu0 %vm78_vm1, %v3282_v52 }
 0x2d1   :  { %2614 = vmatprep.mubr.msk.f32.mxu0 %vm2958_vm0, %v2959_v1 }
 0x2d2   :  { %v3288_v59 = vmax.f32 %v1202_v58, 0.0 }
 0x2d4   :  { %2615 = vmatmul.mubr.msk.f32.gmra.mrb[22].mxu0 %vm78_vm1, %v3288_v59 }
 0x2d5   :  { %2651 = vmatprep.mubr.msk.f32.mxu0 %vm409_vm2, %v3081_v12 }
 0x2e8   :  { %v2575_v61 = vpop.f32.mrb[4].mxu0 }
 0x2e9   :  { %v1190_v62 = vadd.f32 %v2575_v61, %v2259_v60  ;;  %v1047_v63 = vpop.f32.mrb[5].mxu0 }
 0x2ea   :  { %v1189_v3 = vadd.f32 %v2259_v60, %v1047_v63 }
 0x2eb   :  { %v1192_v8 = vmax.f32 %v1190_v62, 0.0 }
 0x2ec   :  { %v1191_v7 = vmax.f32 %v1189_v3, 0.0 }
 0x2ee   :  { %2597 = vmatprep.mubr.msk.f32.mxu1 %vm78_vm1, %v1191_v7 }
 0x2ef   :  { %2598 = vmatmul.mubr.msk.f32.vlgmr.msra.gmra.mrb[26].mxu1 %vm78_vm1, %v1192_v8 }
 0x2f0   :  { %2819 = vmatpush3.bf16.msra.mxu1 %v2816_v38  ;;  %2625 = vmatprep.mubr.msk.f32.mxu1 %vm78_vm1, %v1191_v7 }
 0x2f1   :  { %2821 = vmatprep.subr.bf16.mxu1 %v2820_v10 }
 0x2f4   :  { %2823 = vmatpush3.bf16.msra.mxu1 %v2820_v10 }
 0x2f5   :  { %2824 = vmatprep.subr.bf16.mxu1 %v2957_v0 }
 0x2f7   :  { %2626 = vmatmul.mubr.msk.f32.vlgmr.msra.gmra.mrb[28].mxu1 %vm78_vm1, %v1192_v8 }
 0x2f8   :  { %2826 = vmatpush3.bf16.msra.mxu1 %v2816_v38  ;;  %2636 = vmatprep.mubr.msk.f32.mxu1 %vm2958_vm0, %v2959_v1 }
 0x2f9   :  { %2827 = vmatprep.subr.bf16.mxu1 %v2957_v0 }
 0x2fc   :  { %2829 = vmatpush3.bf16.msra.mxu1 %v2820_v10 }
 0x2fd   :  { %2841 = vmatprep.subr.bf16.mxu1 %v2957_v0 }
 0x2ff   :  { %2637 = vmatmul.mubr.msk.f32.vlgmr.msra.gmra.mrb[30].mxu1 %vm78_vm1, %v3276_v46 }
 0x300   :  { %2639 = vmatprep.mubr.msk.f32.mxu1 %vm2958_vm0, %v2959_v1 }
 0x303   :  { %2640 = vmatmul.mubr.msk.f32.gmra.mrb[32].mxu1 %vm78_vm1, %v3282_v52 }
 0x304   :  { %2642 = vmatprep.mubr.msk.f32.mxu1 %vm2958_vm0, %v2959_v1 }
 0x307   :  { %2643 = vmatmul.mubr.msk.f32.gmra.mrb[34].mxu1 %vm78_vm1, %v3288_v59 }
 0x308   :  { %2680 = vmatprep.mubr.msk.f32.mxu1 %vm2958_vm0, %v2959_v1 }
 0x39f   :  { %v1366_v12 = vpop.f32.mrb[18].mxu0 }
 0x3a0   :  { %v2610_v14 = vpop.f32.mrb[19].mxu0 }
 0x3a3   :  { %v1371_v15 = vpop.f32.mrb[20].mxu0 }
 0x3a4   :  { %v2837_v17 = vpack.c.bf16 %v1371_v15, %v1366_v12  ;;  %v2613_v18 = vpop.f32.mrb[21].mxu0 }
 0x3a7   :  { %v1376_v19 = vpop.f32.mrb[22].mxu0 }
 0x3a8   :  { %v2616_v20 = vpop.f32.mrb[23].mxu0 }
 0x3c2   :  { %v2599_v25 = vpop.f32.mrb[26].mxu1 }
 0x3c3   :  { %v1282_v26 = vpop.f32.mrb[27].mxu1 }
 0x3c4   :  { %v2842_v29 = vpack.c.bf16 %v2599_v25, %v1282_v26 }
 0x3c6   :  { %2843 = vmatpush3.bf16.msra.mxu1 %v2842_v29 }
 0x3c7   :  { %2845 = vmatprep.subr.bf16.mxu1 %v2844_v27 }
 0x3c9   :  { %2681 = vmatmul.mubr.msk.f32.vlgmr.msra.gmra.mrb[36].mxu1 %vm523_vm3, %v3163_v28 }
 0x3ca   :  { %v2627_v33 = vpop.f32.mrb[28].mxu1  ;;  %2683 = vmatprep.mubr.msk.f32.mxu1 %vm2958_vm0, %v2959_v1  ;;  %2847 = vmatpush3.bf16.msra.mxu1 %v2844_v27 }
 0x3cb   :  { %v1451_v34 = vpop.f32.mrb[29].mxu1  ;;  %2849 = vmatprep.subr.bf16.mxu1 %v2848_v32 }
 0x3cc   :  { %v2835_v35 = vpack.c.bf16 %v2627_v33, %v1451_v34 }
 0x3cd   :  { %2684 = vmatmul.mubr.msk.f32.gmra.mrb[38].mxu1 %vm523_vm3, %v3171_v40 }
 0x3ce   :  { %2686 = vmatprep.mubr.msk.f32.mxu1 %vm2958_vm0, %v2959_v1  ;;  %2851 = vmatpush3.bf16.msra.mxu1 %v2848_v32 }
 0x3cf   :  { %2862 = vmatprep.subr.bf16.mxu1 %v2957_v0 }
 0x3d1   :  { %2687 = vmatmul.mubr.msk.f32.gmra.mrb[40].mxu1 %vm523_vm3, %v3181_v48 }
 0x3d2   :  { %v1526_v28 = vpop.f32.mrb[30].mxu1  ;;  %2697 = vmatprep.mubr.msk.f32.mxu1 %vm78_vm1, %v1191_v7 }
 0x3d3   :  { %v2638_v36 = vpop.f32.mrb[31].mxu1 }
 0x3d5   :  { %2698 = vmatmul.mubr.msk.f32.vlgmr.msra.gmra.mrb[42].mxu1 %vm78_vm1, %v1192_v8 }
 0x3d6   :  { %v1531_v37 = vpop.f32.mrb[32].mxu1  ;;  %2730 = vmatprep.mubr.msk.f32.mxu1 %vm2958_vm0, %v2959_v1 }
 0x3d7   :  { %v2830_v40 = vpack.c.bf16 %v1531_v37, %v1526_v28  ;;  %v2641_v38 = vpop.f32.mrb[33].mxu1 }
 0x3d9   :  { %2831 = vmatprep.subr.bf16.mxu0 %v2830_v40 }
 0x3da   :  { %v1536_v39 = vpop.f32.mrb[34].mxu1  ;;  %2833 = vmatpush3.bf16.msra.mxu0 %v2830_v40 }
 0x3db   :  { %v2644_v41 = vpop.f32.mrb[35].mxu1  ;;  %2649 = vmatprep.subr.mxu0 %v1536_v39 }
 0x3de   :  { %2650 = vmatpush3.msra.mxu0 %v1536_v39 }
 0x3df   :  { %2652 = vmatmul.mubr.msk.f32.vlgmr.msra.gmra.mrb[24].mxu0 %vm409_vm2, %v3094_v16  ;;  %2834 = vmatprep.subr.bf16.mxu0 %v2957_v0 }
 0x3e0   :  { %2836 = vmatpush3.bf16.msra.mxu0 %v2835_v35  ;;  %2658 = vmatprep.mubr.msk.f32.mxu0 %vm2958_vm0, %v2959_v1 }
 0x3e1   :  { %2838 = vmatprep.subr.bf16.mxu0 %v2837_v17 }
 0x3e3   :  { %2659 = vmatmul.mubr.msk.f32.vlgmr.msra.gmra.mrb[26].mxu0 %vm523_vm3, %v3192_v54 }
 0x3e4   :  { %2840 = vmatpush3.bf16.msra.mxu0 %v2837_v17  ;;  %2661 = vmatprep.mubr.msk.f32.mxu0 %vm2958_vm0, %v2959_v1  ;;  %v2299_v17 = vld [vmem:[%s3440_s7] ss:$0 sm:$0xff] }
 0x3e5   :  { %2671 = vmatprep.subr.mxu0 %v1376_v19 }
 0x3e7   :  { %2662 = vmatmul.mubr.msk.f32.gmra.mrb[28].mxu0 %vm523_vm3, %v3199_v55 }
 0x3e8   :  { %2672 = vmatpush3.msra.mxu0 %v1376_v19  ;;  %2664 = vmatprep.mubr.msk.f32.mxu0 %vm2958_vm0, %v2959_v1 }
 0x3e9   :  { %2852 = vmatprep.subr.bf16.mxu0 %v2957_v0 }
 0x3eb   :  { %2665 = vmatmul.mubr.msk.f32.gmra.mrb[30].mxu0 %vm523_vm3, %v3207_v56 }
 0x3ec   :  { %2673 = vmatprep.mubr.msk.f32.mxu0 %vm409_vm2, %v3075_v11 }
 0x3ef   :  { %2674 = vmatmul.mubr.msk.f32.vlgmr.msra.gmra.mrb[24].mxu0 %vm409_vm2, %v3086_v13 }
 0x3f0   :  { %2854 = vmatpush3.bf16.msra.mxu0 %v2844_v27  ;;  %2708 = vmatprep.mubr.msk.f32.mxu0 %vm2958_vm0, %v2959_v1 }
 0x3f1   :  { %2855 = vmatprep.subr.bf16.mxu0 %v2957_v0 }
 0x3f4   :  { %2857 = vmatpush3.bf16.msra.mxu0 %v2848_v32 }
 0x3f7   :  { %2709 = vmatmul.mubr.msk.f32.vlgmr.msra.gmra.mrb[32].mxu0 %vm78_vm1, %v3276_v46 }
 0x3f8   :  { %2711 = vmatprep.mubr.msk.f32.mxu0 %vm2958_vm0, %v2959_v1 }
 0x3fb   :  { %2712 = vmatmul.mubr.msk.f32.gmra.mrb[34].mxu0 %vm78_vm1, %v3282_v52 }
 0x3fc   :  { %2714 = vmatprep.mubr.msk.f32.mxu0 %vm2958_vm0, %v2959_v1 }
 0x3ff   :  { %2715 = vmatmul.mubr.msk.f32.gmra.mrb[36].mxu0 %vm78_vm1, %v3288_v59  ;;  %v2300_v59 = vld [vmem:[%s3441_s8] ss:$0 sm:$0xff] }
 0x400   :  { %2723 = vmatprep.mubr.msk.f32.mxu0 %vm409_vm2, %v3148_v23 }
 0x49c   :  { %v1836_v0 = vpop.f32.mrb[36].mxu1 }
 0x49d   :  { %v2682_v11 = vpop.f32.mrb[37].mxu1 }
 0x4a0   :  { %v1841_v13 = vpop.f32.mrb[38].mxu1 }
 0x4a1   :  { %v2685_v16 = vpop.f32.mrb[39].mxu1 }
 0x4a4   :  { %v1846_v48 = vpop.f32.mrb[40].mxu1 }
 0x4a5   :  { %v2688_v54 = vpop.f32.mrb[41].mxu1 }
 0x4a8   :  { %v2699_v55 = vpop.f32.mrb[42].mxu1 }
 0x4a9   :  { %v1921_v56 = vpop.f32.mrb[43].mxu1 }
 0x4aa   :  { %v2863_v42 = vpack.c.bf16 %v2699_v55, %v1921_v56 }
 0x4ac   :  { %2864 = vmatpush3.bf16.msra.mxu1 %v2863_v42 }
 0x4af   :  { %2731 = vmatmul.mubr.msk.f32.vlgmr.msra.gmra.mrb[44].mxu1 %vm523_vm3, %v3233_v2 }
 0x4b0   :  { %2733 = vmatprep.mubr.msk.f32.mxu1 %vm2958_vm0, %v2959_v1 }
 0x4b3   :  { %2734 = vmatmul.mubr.msk.f32.gmra.mrb[46].mxu1 %vm523_vm3, %v3235_v5 }
 0x4b4   :  { %2736 = vmatprep.mubr.msk.f32.mxu1 %vm2958_vm0, %v2959_v1 }
 0x4b6   :  { %v1681_v23 = vpop.f32.mrb[26].mxu0 }
 0x4b7   :  { %v1837_v43 = vadd.f32 %v1836_v0, %v1681_v23  ;;  %v2660_v44 = vpop.f32.mrb[27].mxu0  ;;  %2737 = vmatmul.mubr.msk.f32.gmra.mrb[48].mxu1 %vm523_vm3, %v3243_v9 }
 0x4ba   :  { %v1686_v45 = vpop.f32.mrb[28].mxu0 }
 0x4bb   :  { %v1842_v46 = vadd.f32 %v1841_v13, %v1686_v45  ;;  %v2663_v47 = vpop.f32.mrb[29].mxu0 }
 0x4be   :  { %v1691_v49 = vpop.f32.mrb[30].mxu0 }
 0x4bf   :  { %v1847_v2 = vadd.f32 %v1846_v48, %v1691_v49  ;;  %v2666_v50 = vpop.f32.mrb[31].mxu0 }
 0x4ca   :  { %v1996_v51 = vpop.f32.mrb[32].mxu0 }
 0x4cb   :  { %v2710_v52 = vpop.f32.mrb[33].mxu0 }
 0x4ce   :  { %v2001_v53 = vpop.f32.mrb[34].mxu0 }
 0x4cf   :  { %v2858_v57 = vpack.c.bf16 %v2001_v53, %v1996_v51  ;;  %v2713_v5 = vpop.f32.mrb[35].mxu0 }
 0x4d1   :  { %2859 = vmatprep.subr.bf16.mxu0 %v2858_v57 }
 0x4d2   :  { %v2006_v58 = vpop.f32.mrb[36].mxu0  ;;  %2861 = vmatpush3.bf16.msra.mxu0 %v2858_v57 }
 0x4d3   :  { %v2716_v1 = vpop.f32.mrb[37].mxu0  ;;  %2721 = vmatprep.subr.mxu0 %v2006_v58 }
 0x4d6   :  { %2722 = vmatpush3.msra.mxu0 %v2006_v58 }
 0x4d7   :  { %2724 = vmatmul.mubr.msk.f32.vlgmr.msra.gmra.mrb[24].mxu0 %vm409_vm2, %v3154_v24 }
 0x582   :  { %v2151_v9 = vpop.f32.mrb[44].mxu1 }
 0x583   :  { %v2167_v60 = vadd.f32 %v2151_v9, %v1837_v43  ;;  %v2732_v61 = vpop.f32.mrb[45].mxu1 }
 0x585   :  { %v2188_v62 = vadd.f32 %v2300_v59, %v2167_v60 }
 0x586   :  { %v2156_v63 = vpop.f32.mrb[46].mxu1 }
 0x587   :  { %v2191_v3 = vmax.f32 %v2188_v62, 0.0  ;;  %v2168_v4 = vadd.f32 %v2156_v63, %v1842_v46  ;;  %v2735_v6 = vpop.f32.mrb[47].mxu1 }
 0x589   :  { %2196 = vst.msk [vmem:[%s3443_s10] sm:$0xff] %vm523_vm3, %v2191_v3  ;;  %v2189_v7 = vadd.f32 %v2300_v59, %v2168_v4 }
 0x58a   :  { %v2161_v8 = vpop.f32.mrb[48].mxu1 }
 0x58b   :  { %v2192_v24 = vmax.f32 %v2189_v7, 0.0  ;;  %v2169_v10 = vadd.f32 %v2161_v8, %v1847_v2  ;;  %v2738_v12 = vpop.f32.mrb[49].mxu1 }
 0x58d   :  { %2197 = vst.msk [vmem:[%s3443_s10 + $0x8] sm:$0xff] %vm523_vm3, %v2192_v24  ;;  %v2190_v14 = vadd.f32 %v2300_v59, %v2169_v10 }
 0x58f   :  { %v2193_v15 = vmax.f32 %v2190_v14, 0.0 }
 0x591   :  { %2198 = vst.msk [vmem:[%s3443_s10 + $0x10] sm:$0xff] %vm523_vm3, %v2193_v15 }
 0x5aa   :  { %v2725_v18 = vpop.f32.mrb[24].mxu0 }
 0x5ab   :  { %v2178_v19 = vadd.f32 %v2725_v18, %v2299_v17  ;;  %v2076_v20 = vpop.f32.mrb[25].mxu0 }
 0x5ac   :  { %v2177_v21 = vadd.f32 %v2299_v17, %v2076_v20 }
 0x5ad   :  { %v2180_v22 = vmax.f32 %v2178_v19, 0.0 }
 0x5ae   :  { %v2179_v25 = vmax.f32 %v2177_v21, 0.0 }
 0x5af   :  { %2195 = vst.msk [vmem:[#allocation7 + $0x8] sm:$0xff] %vm523_vm3, %v2180_v22 }
 0x5b0   :  { %2194 = vst.msk [vmem:[#allocation7] sm:$0xff] %vm523_vm3, %v2179_v25 }
 0x5b1   :  { %2936 = shalt.err (!%p2933_p6)
}
 0x5b2   :  { %s2937_s27 = scalar_lea.hbm %s3442_s9, 256 }
 0x5b3   :  { %p2938_p7 = scmp.ne.s32.totalorder %s3442_s9, %s2937_s27  ;;  %p2941_p8 = scmp.lt.u32.totalorder %s2937_s27, %s3442_s9 }
 0x5b5   :  { %p2943_p9 = pnand %p2941_p8, %p2938_p7 }
 0x5b7   :  { %2946 = shalt.err (!%p2943_p9)
}
 0x5b8   :  { %2210 = dma.vmem_to_hbm [thread:$0]  %s2205_s26, 256, %s3442_s9, [#allocation4], %s2954_s23, %s2954_s23, %s2955_s24  }
 0x5b9   :  { %2951 = dma.done.wait [#allocation4], 256  }
 0x5ba   :  { %2952 = vsyncadd [#allocation4], 4294967040 }
 0x5bb   :  { %2218 = vsyncpa [#allocation3], 1 }
 0x5bc   :  { %2219 = vsyncpa [#allocation6], 1 }
 0x5bd   :  { %2220 = vsyncpa [#allocation4], 1 }

</bundles_post_ra>
